<compile_context>
chip_gen: v7x
topology: tpu7x:2x2x1
jax: 0.10.0
libtpu: 0.0.40
codegen_flags: <defaults>
</compile_context>

<pallas_src>
import numpy as np
import jax
import jax.numpy as jnp
from jax import lax
from jax.experimental import pallas as pl
from jax.experimental.pallas import tpu as pltpu

# ---- module constants (DiscreteNLLLoss.__init__ defaults) -------------------
KEY_OUTPUT = 'metric_depth'
MIN_DEPTH = 0.001
MAX_DEPTH = 10.0
DEPTH_BINS = 64
ALPHA = 1.0
ZETA = 1.0 - MIN_DEPTH            # 0.999
BETA = MAX_DEPTH + ZETA           # 10.999
IGNORE_INDEX = -(DEPTH_BINS + 1)  # -65
_BIN_SCALE = float((DEPTH_BINS - 1) / np.log(BETA / ALPHA))


# ---- Pallas kernel -----------------------------------------------------------
def _make_kernel(hw, tn, t_inner):
    """Build the cross-entropy kernel closed over static sizes."""

    def kernel(logits_ref, depth_ref, sum_out_ref, cnt_out_ref, sum_acc, cnt_acc):
        t = pl.program_id(2)

        @pl.when(t == 0)
        def _():
            sum_acc[...] = jnp.zeros_like(sum_acc)
            cnt_acc[...] = jnp.zeros_like(cnt_acc)

        logits = logits_ref[0]                               # (C, TN) native dtype
        depth = depth_ref[0].astype(jnp.float32)             # (1, TN)

        # Pixel-position mask.  tile_idx is deliberately UNclamped: duplicated
        # tiles (from the unconditional 2-way outer split) and the partial last
        # tile both land at pix >= hw and are masked out.  All masking below is
        # select-based (jnp.where), never multiplicative, so NaN/Inf from
        # out-of-bounds garbage can never leak into the accumulators.
        tile_idx = pl.program_id(1) * t_inner + t
        pix = tile_idx * tn + lax.broadcasted_iota(jnp.int32, depth.shape, 1)
        in_bounds = pix < hw

        # quantize_depth (alpha == 1): round(log(d) / log(beta/alpha) * (bins-1))
        bins = jnp.round(
            jnp.log(jnp.maximum(depth, 1e-30)) * _BIN_SCALE
        ).astype(jnp.int32)

        # Validity keyed off the mask (depth <= 0 sentinel) and bin range, so a
        # valid depth can never collide with / be dropped by IGNORE_INDEX.
        valid = (in_bounds & (depth > 0.0)
                 & (bins >= 0) & (bins < DEPTH_BINS))        # (1, TN)

        # Row max in native dtype (exact); shifted exp / log-sum in f32.
        m = jnp.max(logits, axis=0, keepdims=True)           # (1, TN) native
        x = logits.astype(jnp.float32) - m.astype(jnp.float32)   # (C, TN) f32
        sumexp = jnp.sum(jnp.exp(x), axis=0, keepdims=True)      # (1, TN) f32

        # One-hot pick of the target logit in native dtype (exact: only one
        # non-zero addend per column).  (C,1) iota broadcasts in the compare —
        # no full-size class-index slab is materialized.
        cls = lax.broadcasted_iota(jnp.int32, (logits.shape[0], 1), 0)  # (C, 1)
        tgt = jnp.where(valid, bins, -1)                      # (1, TN)
        picked = jnp.sum(jnp.where(cls == tgt, logits, 0.0),
                         axis=0, keepdims=True).astype(jnp.float32)

        loss = m.astype(jnp.float32) + jnp.log(sumexp) - picked   # (1, TN)

        # Lane-wise partial accumulation (pure VALU adds); no per-step reduce.
        sum_acc[...] += jnp.where(valid, loss, 0.0)
        cnt_acc[...] += valid.astype(jnp.float32)

        @pl.when(t == t_inner - 1)
        def _():
            sum_out_ref[...] = jnp.zeros_like(sum_out_ref) + jnp.sum(sum_acc[...])
            cnt_out_ref[...] = jnp.zeros_like(cnt_out_ref) + jnp.sum(cnt_acc[...])

    return kernel


# ---- plain-JAX glue ----------------------------------------------------------
def _interp_matrix(out_s, in_s):
    """align_corners=True 1-D linear interpolation matrix, shape (out_s, in_s)."""
    if out_s == 1 or in_s == 1:
        src = jnp.zeros((out_s,), jnp.float32)
    else:
        src = jnp.arange(out_s, dtype=jnp.float32) * ((in_s - 1) / (out_s - 1))
    i0 = jnp.floor(src).astype(jnp.int32)
    i1 = jnp.minimum(i0 + 1, in_s - 1)
    w = src - i0.astype(jnp.float32)
    return (jax.nn.one_hot(i0, in_s, dtype=jnp.float32) * (1.0 - w)[:, None]
            + jax.nn.one_hot(i1, in_s, dtype=jnp.float32) * w[:, None])


def _bilinear_align_corners(x, out_hw):
    """F.interpolate(mode='bilinear', align_corners=True) via two MXU einsums."""
    N, C, H, W = x.shape
    OH, OW = out_hw
    orig = x.dtype
    my = _interp_matrix(OH, H)                    # (OH, H)
    mx = _interp_matrix(OW, W)                    # (OW, W)
    y = jnp.einsum('nchw,oh->ncow', x.astype(jnp.float32), my)
    y = jnp.einsum('ncow,pw->ncop', y, mx)
    return y.astype(orig)


def discrete_nll_loss(logits, target, mask=None, interpolate=True,
                      return_interpolated=False, tile_pixels=8192):
    """Forward pass of DiscreteNLLLoss. Returns scalar f32 loss."""
    assert tile_pixels % 128 == 0
    if isinstance(logits, dict):                  # extract_key(prediction, KEY_OUTPUT)
        logits = logits[KEY_OUTPUT]
    N, C, H, W = logits.shape
    assert C == DEPTH_BINS

    if target.ndim == 3:
        target = target[:, None]                  # -> N,1,H,W
    TH, TW = target.shape[-2:]
    if (H, W) != (TH, TW) and interpolate:
        logits = _bilinear_align_corners(logits, (TH, TW))
        H, W = TH, TW
    intr_input = logits
    assert (H, W) == (TH, TW)

    hw = H * W
    # Free reshape: class dim stays on sublanes, pixels on lanes. No transpose,
    # no dtype upcast (bf16 logits stay bf16 in HBM; upcast happens in-kernel).
    logits3 = logits.reshape(N, C, hw)
    depth3 = target.reshape(N, 1, hw).astype(jnp.float32)
    if mask is not None:
        if mask.ndim == 3:
            mask = mask[:, None]
        # Fold mask into the depth stream: sentinel 0.0 => ignored pixel.
        # (Torch also rewrites the masked logits, but those pixels are ignored
        # by CrossEntropyLoss anyway, so this is loss-equivalent.)
        depth3 = jnp.where(mask.reshape(N, 1, hw) != 0, depth3, 0.0)

    tn = hw if hw <= tile_pixels else tile_pixels
    n_tiles = pl.cdiv(hw, tn)
    # Unconditional 2-way outer ("parallel") split so the second TensorCore on
    # v7x always gets work, even when N == 1 and n_tiles is odd.  Any duplicated
    # tile generated by the cdiv is clamped in the index_map and fully masked in
    # the kernel via pix < hw, so it contributes nothing.
    n_outer = 2 if n_tiles >= 2 else 1
    t_inner = pl.cdiv(n_tiles, n_outer)

    def _in_idx(n, o, t):
        return (n, 0, jnp.minimum(o * t_inner + t, n_tiles - 1))

    # VMEM budget: double-buffered input blocks + the in-kernel f32 slabs.
    # tn=8192 keeps this well under 32 MiB, safe even on v7x (64 MiB physical).
    itemsize = jnp.dtype(logits3.dtype).itemsize
    vmem_budget = (2 * C * tn * itemsize      # double-buffered logits blocks
                   + 2 * tn * 4               # double-buffered depth blocks
                   + 4 * C * tn * 4           # in-kernel f32 temporaries
                   + 4 * tn * 4               # accumulators + small temps
                   + (2 << 20))               # headroom
    vmem_limit = int(min(max(vmem_budget, 32 << 20), 64 << 20))

    kernel = _make_kernel(hw, tn, t_inner)
    sums, cnts = pl.pallas_call(
        kernel,
        out_shape=(jax.ShapeDtypeStruct((N * n_outer, 1, 128), jnp.float32),
                   jax.ShapeDtypeStruct((N * n_outer, 1, 128), jnp.float32)),
        grid_spec=pltpu.PrefetchScalarGridSpec(
            num_scalar_prefetch=0,
            grid=(N, n_outer, t_inner),
            in_specs=[
                pl.BlockSpec((1, C, tn), _in_idx),
                pl.BlockSpec((1, 1, tn), _in_idx),
            ],
            out_specs=(
                pl.BlockSpec((1, 1, 128), lambda n, o, t: (n * n_outer + o, 0, 0)),
                pl.BlockSpec((1, 1, 128), lambda n, o, t: (n * n_outer + o, 0, 0)),
            ),
            scratch_shapes=[
                pltpu.VMEM((1, tn), jnp.float32),   # per-lane loss-sum partials
                pltpu.VMEM((1, tn), jnp.float32),   # per-lane valid-count partials
            ],
        ),
        compiler_params=pltpu.CompilerParams(
            dimension_semantics=("parallel", "parallel", "arbitrary"),
            vmem_limit_bytes=vmem_limit),
    )(logits3, depth3)

    # Final mean in plain JAX (tiny). If no pixel is valid this is 0/0 == nan,
    # matching torch.nn.CrossEntropyLoss with all targets ignored.
    loss = jnp.sum(sums[:, 0, 0]) / jnp.sum(cnts[:, 0, 0])
    # Note: pixels whose quantized bin falls outside [0, DEPTH_BINS) (depth
    # outside ~[MIN_DEPTH, MAX_DEPTH]) are dropped here; PyTorch's
    # CrossEntropyLoss would raise on such targets, so this only differs on
    # inputs the reference module cannot handle.
    if return_interpolated:
        return loss, intr_input
    return loss


# ---- pure-JAX reference (for correctness check only) ------------------------
def _ref_loss(logits, target, mask=None):
    logits = logits.astype(jnp.float32)
    if target.ndim == 3:
        target = target[:, None]
    bins = jnp.round(jnp.log(target / ALPHA) / np.log(BETA / ALPHA)
                     * (DEPTH_BINS - 1)).astype(jnp.int32)
    if mask is not None:
        if mask.ndim == 3:
            mask = mask[:, None]
        m = mask.astype(jnp.int32)
        bins = bins * m + (1 - m) * IGNORE_INDEX
    N, C, H, W = logits.shape
    logp = jax.nn.log_softmax(logits.reshape(N, C, H * W), axis=1)
    tgt = bins.reshape(N, H * W)
    valid = tgt != IGNORE_INDEX
    safe = jnp.clip(tgt, 0, C - 1)
    picked = jnp.take_along_axis(logp, safe[:, None, :], axis=1)[:, 0, :]
    return -(jnp.where(valid, picked, 0.0).sum() / valid.sum())


if __name__ == "__main__":
    key = jax.random.PRNGKey(0)
    k1, k2, k3, k4, k5, k6, k7, k8 = jax.random.split(key, 8)

    # 1) f32 logits, no mask, default (single) pixel tile
    N, C, H, W = 2, DEPTH_BINS, 16, 16
    logits = jax.random.normal(k1, (N, C, H, W), dtype=jnp.float32)
    target = jax.random.uniform(k2, (N, H, W), minval=1.0, maxval=10.0,
                                dtype=jnp.float32)
    out1 = jax.block_until_ready(discrete_nll_loss(logits, target))
    ref1 = jax.block_until_ready(_ref_loss(logits, target))
    if not np.allclose(np.asarray(out1), np.asarray(ref1), rtol=1e-4, atol=1e-5):
        raise AssertionError(f"mismatch (case 1): kernel={out1} ref={ref1}")

    # 2) bf16 logits + mask, even tile count (n_outer=2, t_inner=1)
    logits_bf = jax.random.normal(k3, (N, C, H, W),
                                  dtype=jnp.float32).astype(jnp.bfloat16)
    mask = (jax.random.uniform(k4, (N, H, W)) > 0.3).astype(jnp.int32)
    out2 = jax.block_until_ready(
        discrete_nll_loss(logits_bf, target, mask=mask, tile_pixels=128))
    ref2 = jax.block_until_ready(_ref_loss(logits_bf, target, mask=mask))
    if not np.allclose(np.asarray(out2), np.asarray(ref2), rtol=2e-3, atol=1e-4):
        raise AssertionError(f"mismatch (case 2): kernel={out2} ref={ref2}")

    # 3) odd tile count + partial last tile (H*W = 324): exercises the clamped
    #    index_map and the fully-masked duplicated tile of the 2-way split.
    H3, W3 = 18, 18
    logits_p = jax.random.normal(k5, (1, C, H3, W3), dtype=jnp.float32)
    target_p = jax.random.uniform(k6, (1, H3, W3), minval=1.0, maxval=10.0,
                                  dtype=jnp.float32)
    out3 = jax.block_until_ready(
        discrete_nll_loss(logits_p, target_p, tile_pixels=128))
    ref3 = jax.block_until_ready(_ref_loss(logits_p, target_p))
    if not np.allclose(np.asarray(out3), np.asarray(ref3), rtol=1e-4, atol=1e-5):
        raise AssertionError(f"mismatch (case 3): kernel={out3} ref={ref3}")

    # 4) interpolation path (low-res logits, high-res target) + tuple return
    logits_lo = jax.random.normal(k7, (1, C, 8, 8), dtype=jnp.float32)
    target_hi = jax.random.uniform(k8, (1, 16, 16), minval=1.0, maxval=10.0,
                                   dtype=jnp.float32)
    out4, intr = discrete_nll_loss(logits_lo, target_hi, return_interpolated=True)
    out4 = jax.block_until_ready(out4)
    ref4 = jax.block_until_ready(
        _ref_loss(_bilinear_align_corners(logits_lo, (16, 16)), target_hi))
    if intr.shape != (1, C, 16, 16):
        raise AssertionError(f"bad interpolated shape: {intr.shape}")
    if not np.allclose(np.asarray(out4), np.asarray(ref4), rtol=1e-4, atol=1e-5):
        raise AssertionError(f"mismatch (case 4): kernel={out4} ref={ref4}")

    print("KERNEL_OK")
</pallas_src>

<mosaic_0001>
module attributes {stable_mosaic.version = 11 : i64} {
  func.func @kernel(%arg0: i32, %arg1: i32, %arg2: i32, %arg3: memref<1x64x256xf32, #tpu.memory_space<vmem>>, %arg4: memref<1x1x256xf32, #tpu.memory_space<vmem>>, %arg5: memref<1x1x128xf32, #tpu.memory_space<vmem>>, %arg6: memref<1x1x128xf32, #tpu.memory_space<vmem>>, %arg7: memref<1x256xf32, #tpu.memory_space<vmem>>, %arg8: memref<1x256xf32, #tpu.memory_space<vmem>>) attributes {dimension_semantics = [#tpu.dimension_semantics<parallel>, #tpu.dimension_semantics<parallel>, #tpu.dimension_semantics<arbitrary>], iteration_bounds = array<i64: 2, 1, 1>, scalar_prefetch = 0 : i64, scratch_operands = 2 : i64, tpu.core_type = #tpu.core_type<tc>, window_params = [{transform_indices = @transform_0, window_bounds = array<i64: 1, 64, 256>}, {transform_indices = @transform_1, window_bounds = array<i64: 1, 1, 256>}, {transform_indices = @transform_2, window_bounds = array<i64: 1, 1, 128>}, {transform_indices = @transform_3, window_bounds = array<i64: 1, 1, 128>}]} {
    %c0_i32 = arith.constant 0 : i32
    %0 = arith.cmpi eq, %arg2, %c0_i32 : i32
    %1 = arith.extui %0 : i1 to i32
    %c0_i32_0 = arith.constant 0 : i32
    %2 = arith.cmpi ne, %1, %c0_i32_0 : i32
    scf.if %2 {
      %cst_25 = arith.constant 0.000000e+00 : f32
      %64 = vector.broadcast %cst_25 : f32 to vector<1x256xf32>
      %c0_26 = arith.constant 0 : index
      %c0_27 = arith.constant 0 : index
      %65 = vector.load %arg7[%c0_26, %c0_27] : memref<1x256xf32, #tpu.memory_space<vmem>>, vector<1x256xf32>
      tpu.vector_store %arg7[%c0_26, %c0_27], %64 {strides = array<i32>} : memref<1x256xf32, #tpu.memory_space<vmem>>, vector<1x256xf32>,
      %cst_28 = arith.constant 0.000000e+00 : f32
      %66 = vector.broadcast %cst_28 : f32 to vector<1x256xf32>
      %c0_29 = arith.constant 0 : index
      %c0_30 = arith.constant 0 : index
      %67 = vector.load %arg8[%c0_29, %c0_30] : memref<1x256xf32, #tpu.memory_space<vmem>>, vector<1x256xf32>
      tpu.vector_store %arg8[%c0_29, %c0_30], %66 {strides = array<i32>} : memref<1x256xf32, #tpu.memory_space<vmem>>, vector<1x256xf32>,
    } else {
    }
    %c0 = arith.constant 0 : index
    %c0_1 = arith.constant 0 : index
    %c0_2 = arith.constant 0 : index
    %3 = vector.load %arg3[%c0, %c0_1, %c0_2] : memref<1x64x256xf32, #tpu.memory_space<vmem>>, vector<1x64x256xf32>
    %4 = vector.shape_cast %3 : vector<1x64x256xf32> to vector<64x256xf32>
    %c0_3 = arith.constant 0 : index
    %c0_4 = arith.constant 0 : index
    %c0_5 = arith.constant 0 : index
    %5 = vector.load %arg4[%c0_3, %c0_4, %c0_5] : memref<1x1x256xf32, #tpu.memory_space<vmem>>, vector<1x1x256xf32>
    %6 = vector.shape_cast %5 : vector<1x1x256xf32> to vector<1x256xf32>
    %c1_i32 = arith.constant 1 : i32
    %7 = arith.muli %arg1, %c1_i32 : i32
    %8 = arith.addi %7, %arg2 : i32
    %c256_i32 = arith.constant 256 : i32
    %9 = arith.muli %8, %c256_i32 : i32
    %10 = tpu.iota {dimensions = array<i32: 1>} : vector<1x256xi32>
    %11 = vector.broadcast %9 : i32 to vector<1x256xi32>
    %12 = arith.addi %11, %10 : vector<1x256xi32>
    %c256_i32_6 = arith.constant 256 : i32
    %13 = vector.broadcast %c256_i32_6 : i32 to vector<1x256xi32>
    %14 = arith.cmpi slt, %12, %13 : vector<1x256xi32>
    %cst = arith.constant 1.000000e-30 : f32
    %15 = vector.broadcast %cst : f32 to vector<1x256xf32>
    %16 = arith.maximumf %6, %15 : vector<1x256xf32>
    %17 = math.log %16 : vector<1x256xf32>
    %cst_7 = arith.constant 26.2740364 : f32
    %18 = vector.broadcast %cst_7 : f32 to vector<1x256xf32>
    %19 = arith.mulf %17, %18 : vector<1x256xf32>
    %20 = math.roundeven %19 : vector<1x256xf32>
    %21 = arith.fptosi %20 : vector<1x256xf32> to vector<1x256xi32>
    %cst_8 = arith.constant 0.000000e+00 : f32
    %22 = vector.broadcast %cst_8 : f32 to vector<1x256xf32>
    %23 = arith.cmpf ogt, %6, %22 : vector<1x256xf32>
    %24 = arith.andi %14, %23 : vector<1x256xi1>
    %c0_i32_9 = arith.constant 0 : i32
    %25 = vector.broadcast %c0_i32_9 : i32 to vector<1x256xi32>
    %26 = arith.cmpi sge, %21, %25 : vector<1x256xi32>
    %27 = arith.andi %24, %26 : vector<1x256xi1>
    %c64_i32 = arith.constant 64 : i32
    %28 = vector.broadcast %c64_i32 : i32 to vector<1x256xi32>
    %29 = arith.cmpi slt, %21, %28 : vector<1x256xi32>
    %30 = arith.andi %27, %29 : vector<1x256xi1>
    %cst_10 = arith.constant dense<0xFF800000> : vector<256xf32>
    %31 = vector.multi_reduction <maximumf>, %4, %cst_10 [0] : vector<64x256xf32> to vector<256xf32>
    %32 = vector.shape_cast %31 : vector<256xf32> to vector<1x256xf32>
    %33 = vector.broadcast %32 : vector<1x256xf32> to vector<64x256xf32>
    %34 = arith.subf %4, %33 : vector<64x256xf32>
    %35 = math.exp %34 : vector<64x256xf32>
    %cst_11 = arith.constant dense<0.000000e+00> : vector<256xf32>
    %36 = vector.multi_reduction <add>, %35, %cst_11 [0] : vector<64x256xf32> to vector<256xf32>
    %37 = vector.shape_cast %36 : vector<256xf32> to vector<1x256xf32>
    %38 = tpu.iota {dimensions = array<i32: 0>} : vector<64x1xi32>
    %c-1_i32 = arith.constant -1 : i32
    %39 = vector.broadcast %c-1_i32 : i32 to vector<1x256xi32>
    %40 = arith.select %30, %21, %39 : vector<1x256xi1>, vector<1x256xi32>
    %41 = vector.broadcast %38 : vector<64x1xi32> to vector<64x256xi32>
    %42 = vector.broadcast %40 : vector<1x256xi32> to vector<64x256xi32>
    %43 = arith.cmpi eq, %41, %42 : vector<64x256xi32>
    %cst_12 = arith.constant 0.000000e+00 : f32
    %44 = vector.broadcast %cst_12 : f32 to vector<64x256xf32>
    %45 = arith.select %43, %4, %44 : vector<64x256xi1>, vector<64x256xf32>
    %cst_13 = arith.constant dense<0.000000e+00> : vector<256xf32>
    %46 = vector.multi_reduction <add>, %45, %cst_13 [0] : vector<64x256xf32> to vector<256xf32>
    %47 = vector.shape_cast %46 : vector<256xf32> to vector<1x256xf32>
    %48 = math.log %37 : vector<1x256xf32>
    %49 = arith.addf %32, %48 : vector<1x256xf32>
    %50 = arith.subf %49, %47 : vector<1x256xf32>
    %c0_14 = arith.constant 0 : index
    %c0_15 = arith.constant 0 : index
    %51 = vector.load %arg7[%c0_14, %c0_15] : memref<1x256xf32, #tpu.memory_space<vmem>>, vector<1x256xf32>
    %cst_16 = arith.constant 0.000000e+00 : f32
    %52 = vector.broadcast %cst_16 : f32 to vector<1x256xf32>
    %53 = arith.select %30, %50, %52 : vector<1x256xi1>, vector<1x256xf32>
    %54 = arith.addf %51, %53 : vector<1x256xf32>
    %c0_17 = arith.constant 0 : index
    %c0_18 = arith.constant 0 : index
    %55 = vector.load %arg7[%c0_17, %c0_18] : memref<1x256xf32, #tpu.memory_space<vmem>>, vector<1x256xf32>
    tpu.vector_store %arg7[%c0_17, %c0_18], %54 {strides = array<i32>} : memref<1x256xf32, #tpu.memory_space<vmem>>, vector<1x256xf32>,
    %c0_19 = arith.constant 0 : index
    %c0_20 = arith.constant 0 : index
    %56 = vector.load %arg8[%c0_19, %c0_20] : memref<1x256xf32, #tpu.memory_space<vmem>>, vector<1x256xf32>
    %57 = arith.extui %30 : vector<1x256xi1> to vector<1x256xi32>
    %58 = arith.sitofp %57 : vector<1x256xi32> to vector<1x256xf32>
    %59 = arith.addf %56, %58 : vector<1x256xf32>
    %c0_21 = arith.constant 0 : index
    %c0_22 = arith.constant 0 : index
    %60 = vector.load %arg8[%c0_21, %c0_22] : memref<1x256xf32, #tpu.memory_space<vmem>>, vector<1x256xf32>
    tpu.vector_store %arg8[%c0_21, %c0_22], %59 {strides = array<i32>} : memref<1x256xf32, #tpu.memory_space<vmem>>, vector<1x256xf32>,
    %c0_i32_23 = arith.constant 0 : i32
    %61 = arith.cmpi eq, %arg2, %c0_i32_23 : i32
    %62 = arith.extui %61 : i1 to i32
    %c0_i32_24 = arith.constant 0 : i32
    %63 = arith.cmpi ne, %62, %c0_i32_24 : i32
    scf.if %63 {
      %cst_25 = arith.constant 0.000000e+00 : f32
      %64 = vector.broadcast %cst_25 : f32 to vector<1x1x128xf32>
      %c0_26 = arith.constant 0 : index
      %c0_27 = arith.constant 0 : index
      %65 = vector.load %arg7[%c0_26, %c0_27] : memref<1x256xf32, #tpu.memory_space<vmem>>, vector<1x256xf32>
      %66 = vector.shape_cast %65 : vector<1x256xf32> to vector<1x1x256xf32>
      %cst_28 = arith.constant dense<0.000000e+00> : vector<1xf32>
      %67 = vector.multi_reduction <add>, %66, %cst_28 [1, 2] : vector<1x1x256xf32> to vector<1xf32>
      %68 = vector.shape_cast %67 : vector<1xf32> to vector<1x1x1xf32>
      %69 = vector.extract %68[0, 0, 0] : f32 from vector<1x1x1xf32>
      %70 = vector.broadcast %69 : f32 to vector<1x1x128xf32>
      %71 = arith.addf %64, %70 : vector<1x1x128xf32>
      %c0_29 = arith.constant 0 : index
      %c0_30 = arith.constant 0 : index
      %c0_31 = arith.constant 0 : index
      %72 = vector.load %arg5[%c0_29, %c0_30, %c0_31] : memref<1x1x128xf32, #tpu.memory_space<vmem>>, vector<1x1x128xf32>
      tpu.vector_store %arg5[%c0_29, %c0_30, %c0_31], %71 {strides = array<i32>} : memref<1x1x128xf32, #tpu.memory_space<vmem>>, vector<1x1x128xf32>,
      %cst_32 = arith.constant 0.000000e+00 : f32
      %73 = vector.broadcast %cst_32 : f32 to vector<1x1x128xf32>
      %c0_33 = arith.constant 0 : index
      %c0_34 = arith.constant 0 : index
      %74 = vector.load %arg8[%c0_33, %c0_34] : memref<1x256xf32, #tpu.memory_space<vmem>>, vector<1x256xf32>
      %75 = vector.shape_cast %74 : vector<1x256xf32> to vector<1x1x256xf32>
      %cst_35 = arith.constant dense<0.000000e+00> : vector<1xf32>
      %76 = vector.multi_reduction <add>, %75, %cst_35 [1, 2] : vector<1x1x256xf32> to vector<1xf32>
      %77 = vector.shape_cast %76 : vector<1xf32> to vector<1x1x1xf32>
      %78 = vector.extract %77[0, 0, 0] : f32 from vector<1x1x1xf32>
      %79 = vector.broadcast %78 : f32 to vector<1x1x128xf32>
      %80 = arith.addf %73, %79 : vector<1x1x128xf32>
      %c0_36 = arith.constant 0 : index
      %c0_37 = arith.constant 0 : index
      %c0_38 = arith.constant 0 : index
      %81 = vector.load %arg6[%c0_36, %c0_37, %c0_38] : memref<1x1x128xf32, #tpu.memory_space<vmem>>, vector<1x1x128xf32>
      tpu.vector_store %arg6[%c0_36, %c0_37, %c0_38], %80 {strides = array<i32>} : memref<1x1x128xf32, #tpu.memory_space<vmem>>, vector<1x1x128xf32>,
    } else {
    }
    return
  }
  func.func @transform_0(%arg0: i32, %arg1: i32, %arg2: i32) -> (i32, i32, i32) {
    %c1_i32 = arith.constant 1 : i32
    %0 = arith.muli %arg1, %c1_i32 : i32
    %1 = arith.addi %0, %arg2 : i32
    %c0_i32 = arith.constant 0 : i32
    %2 = arith.minsi %1, %c0_i32 : i32
    %c0_i32_0 = arith.constant 0 : i32
    %c0_i32_1 = arith.constant 0 : i32
    return %arg0, %c0_i32_0, %2 : i32, i32, i32
  }
  func.func @transform_1(%arg0: i32, %arg1: i32, %arg2: i32) -> (i32, i32, i32) {
    %c1_i32 = arith.constant 1 : i32
    %0 = arith.muli %arg1, %c1_i32 : i32
    %1 = arith.addi %0, %arg2 : i32
    %c0_i32 = arith.constant 0 : i32
    %2 = arith.minsi %1, %c0_i32 : i32
    %c0_i32_0 = arith.constant 0 : i32
    %c0_i32_1 = arith.constant 0 : i32
    return %arg0, %c0_i32_0, %2 : i32, i32, i32
  }
  func.func @transform_2(%arg0: i32, %arg1: i32, %arg2: i32) -> (i32, i32, i32) {
    %c1_i32 = arith.constant 1 : i32
    %0 = arith.muli %arg0, %c1_i32 : i32
    %1 = arith.addi %0, %arg1 : i32
    %c0_i32 = arith.constant 0 : i32
    %c0_i32_0 = arith.constant 0 : i32
    %c0_i32_1 = arith.constant 0 : i32
    return %1, %c0_i32, %c0_i32_0 : i32, i32, i32
  }
  func.func @transform_3(%arg0: i32, %arg1: i32, %arg2: i32) -> (i32, i32, i32) {
    %c1_i32 = arith.constant 1 : i32
    %0 = arith.muli %arg0, %c1_i32 : i32
    %1 = arith.addi %0, %arg1 : i32
    %c0_i32 = arith.constant 0 : i32
    %c0_i32_0 = arith.constant 0 : i32
    %c0_i32_1 = arith.constant 0 : i32
    return %1, %c0_i32, %c0_i32_0 : i32, i32, i32
  }
}

</mosaic_0001>

<bundles_post_ra>
// kernel: tpu_custom_call.1
= control target key start
LH: loop header
LB: loop body
LE: loop exit
PB: predicated region body
PF: predicated region fallthrough
CT: control target
= control target key end

     0   :  { %9 = vsyncpa [#allocation5], 0  ;;  %s1775_s0 = inlined_call_operand.hbm [shape: f32[2,64,256], index: 0, kind: input, shape index: {}]   ;;  %s1776_s1 = inlined_call_operand.hbm [shape: f32[2,1,256], index: 1, kind: input, shape index: {}]   ;;  %s1777_s2 = inlined_call_operand.hbm [shape: f32[2,1,128], index: 2, kind: output, shape index: {0}]   ;;  %s1778_s3 = inlined_call_operand.hbm [shape: f32[2,1,128], index: 3, kind: output, shape index: {1}]  }
   0x1   :  { %11 = vsyncpa [#allocation5 + $0x1], 0 }
   0x2   :  { %12 = vsyncpa [#allocation8], 0 }
   0x3   :  { %14 = vsyncpa [#allocation8 + $0x1], 0 }
   0x4   :  { %15 = vsyncpa [#allocation6], 0 }
   0x5   :  { %17 = vsyncpa [#allocation6 + $0x1], 0 }
   0x6   :  { %18 = vsyncpa [#allocation11], 0 }
   0x7   :  { %20 = vsyncpa [#allocation11 + $0x1], 0  ;;  %s1202_s12 = smov 0   ;;  %s1204_s13 = smov 0  }
   0x8   :  { %s1206_s14 = smov 0   ;;  %s1208_s15 = smov 0  }
   0x9   :  { %s1210_s16 = smov 0   ;;  %s1212_s17 = smov 0  }
   0xa LB: > { %s850_s18 = sadd.s32 4294967295, %s1171_s17   ;;  %s851_s19 = sadd.s32 4294967294, %s1171_s17   ;;  %s1171_s17 = sphi %s1212_s17, %s26_s17   ;;  %s1167_s16 = sphi %s1210_s16, %s1811_s16   ;;  %s1163_s15 = sphi %s1208_s15, %s1810_s15   ;;  %s1159_s14 = sphi %s1206_s14, %s1809_s14   ;;  %s1155_s13 = sphi %s1204_s13, %s1808_s13   ;;  %s1151_s12 = sphi %s1202_s12, %s1807_s12  }
   0xb   : > { %s45_s20 = sadd.s32 1, %s1167_s16  ;;  %s60_s21 = sadd.s32 1, %s1159_s14 }
   0xc   : > { %p47_p0 = scmp.ge.s32.totalorder %s45_s20, 2  ;;  %p67_p1 = scmp.ne.s32.totalorder %s1159_s14, %s1155_s13 }
   0xd   : > { %p68_p2 = scmp.eq.s32.totalorder %s1171_s17, 0  ;;  %p73_p3 = scmp.ne.s32.totalorder %s1155_s13, %s1151_s12 }
   0xe   : > { %s1813_s20 = smov (%p47_p0, %s45_s20), 0  ;;  %p74_p5 = scmp.eq.s32.totalorder %s850_s18, 0 }
   0xf   : > { %p1243_p4 = por %p68_p2, %p67_p1  ;;  %s55_s23 = ssub.s32 %s1167_s16, %s1813_s20 }
  0x10   : > { %p133_p6 = scmp.eq.s32.totalorder %s850_s18, 1  ;;  %p58_p7 = scmp.eq.s32.totalorder %s55_s23, 0 }
  0x11   : > { %p1249_p8 = por %p74_p5, %p73_p3  ;;  %p139_p10 = scmp.eq.s32.totalorder %s851_s19, 1 }
  0x12   : > { %p1253_p9 = por %p133_p6, %p67_p1  ;;  %p900_p13 = scmp.lt.s32.totalorder %s1171_s17, 2 }
  0x13   : > { %s1782_s24 = scalar_select %p1249_p8, 1, 0 }
  0x14   : > { %s1783_s25 = scalar_select %p1253_p9, 1, 0 }
  0x15   : > { %s1258_s26 = scalar_select %p58_p7, %s1159_s14, %s60_s21  }
  0x16   : > { %p1260_p11 = por %p139_p10, %p73_p3  ;;  %s1267_s28 = sand.u32 1, %s1159_s14  }
  0x17   : > { %s854_s29 = sshll.u32 %s1267_s28, 7  ;;  %s869_s30 = sshll.u32 %s1167_s16, 11 }
  0x18   : > { %s1784_s27 = scalar_select %p1260_p11, 1, 0 }
  0x19   : > { %s1274_s6 = scalar_lea.hbm %s1775_s0, %s869_s30  ;;  %s191_s7 = scalar_lea.vmem [#allocation4], %s854_s29 }
  0x1a   : > { %s203_s8 = sshll.u32 %s191_s7, 4  ;;  %p1280_p0 = pnand %p900_p13, %p1243_p4  ;;  %s1276_s8 = int_to_ptr.vmem [resolvable:$true] %s203_s8 }
  0x1b   : > { %s188_s10 = scalar_lea.sflag [#allocation5], %s1267_s28  ;;  %s993_s11 = scalar_lea.hbm %s1274_s6, 2048 }
  0x1c   : > { %p994_p2 = scmp.ne.s32.totalorder %s1274_s6, %s993_s11  ;;  %p995_p3 = pneg %p1280_p0 }
  0x1d   : > { %s998_s21 = scalar_lea.hbm %s1775_s0, 4096  ;;  %p999_p4 = scmp.lt.u32.totalorder %s1274_s6, %s1775_s0 }
  0x1e   : > { %p996_p5 = pnand %p995_p3, %p994_p2  ;;  %p1000_p7 = scmp.lt.u32.totalorder %s998_s21, %s993_s11 }
  0x1f   : > { %p1002_p13 = scmp.lt.u32.totalorder %s993_s11, %s1274_s6 }
  0x20   : > { %p997_p6 = pneg %p996_p5  ;;  %p1001_p10 = por %p1000_p7, %p999_p4 }
  0x22   : > { %p1003_p12 = por %p1002_p13, %p1001_p10 }
  0x24   : > { %p1004_p1 = pnand %p1003_p12, %p997_p6 }
  0x26   : > { %1007 = shalt.err (!%p1004_p1)
}
  0x27   : > { %s1008_s29 = scalar_lea.vmem %s1276_s8, 2048  ;;  %s1173_s30 = smov [#allocation4]  }
  0x28   : > { %p1009_p2 = scmp.ne.s32.totalorder %s1276_s8, %s1008_s29  ;;  %s1013_s4 = sshll.u32 %s1173_s30, 4  ;;  %s1014_s4 = int_to_ptr.vmem [resolvable:$false] %s1013_s4 }
  0x29   : > { %s1015_s5 = scalar_lea.vmem %s1014_s4, 4096  ;;  %p1016_p9 = scmp.lt.s32.totalorder %s1276_s8, %s1014_s4 }
  0x2a   : > { %p1011_p5 = pnand %p1009_p2, %p995_p3  ;;  %p1017_p4 = scmp.lt.s32.totalorder %s1015_s5, %s1008_s29 }
  0x2c   : > { %p1012_p11 = pneg %p1011_p5  ;;  %p1018_p7 = por %p1017_p4, %p1016_p9 }
  0x2e   : > { %p1019_p10 = pnand %p1018_p7, %p1012_p11 }
  0x30   : > { %1022 = shalt.err (!%p1019_p10)
}
  0x31   : > { %s1174_s7 = smov 256   ;;  %s1175_s11 = smov 16  }
  0x32   : > { %889 = dma.hbm_to_vmem [thread:$0]  (!%p1280_p0), %s1274_s6, 2048, %s1276_s8, %s188_s10, %s1174_s7, %s1174_s7, %s1175_s11  }
  0x33   : > { %p235_p12 = scmp.lt.s32.totalorder %s1171_s17, 3  ;;  %s857_s18 = sshll.u32 %s1267_s28, 1 }
  0x34   : > { %s870_s19 = sshll.u32 %s1167_s16, 5  ;;  %p1786_p9 = scmp.ge.s32.totalorder %s1171_s17, 1 }
  0x35   : > { %s1325_s29 = scalar_lea.hbm %s1776_s1, %s870_s19  ;;  %s217_s30 = scalar_lea.vmem [#allocation7], %s857_s18 }
  0x36   : > { %p1318_p11 = pnand %p1786_p9, %p235_p12  ;;  %s230_s4 = sshll.u32 %s217_s30, 4  ;;  %s231_s4 = int_to_ptr.vmem [resolvable:$true] %s230_s4 }
  0x37   : > { %s214_s6 = scalar_lea.sflag [#allocation8], %s1267_s28  ;;  %s1023_s8 = scalar_lea.hbm %s1325_s29, 32 }
  0x38   : > { %s1787_s21 = scalar_select %p1318_p11, 1, 0 }
  0x39   : > { %p1024_p1 = scmp.ne.s32.totalorder %s1325_s29, %s1023_s8  ;;  %s1028_s7 = scalar_lea.hbm %s1776_s1, 64 }
  0x3a   : > { %p1029_p2 = scmp.lt.u32.totalorder %s1325_s29, %s1776_s1  ;;  %p1030_p5 = scmp.lt.u32.totalorder %s1028_s7, %s1023_s8 }
  0x3b   : > { %p1026_p6 = pnand %p1024_p1, %p995_p3  ;;  %p1032_p7 = scmp.lt.u32.totalorder %s1023_s8, %s1325_s29 }
  0x3c   : > { %p1031_p4 = por %p1030_p5, %p1029_p2 }
  0x3d   : > { %p1027_p13 = pneg %p1026_p6 }
  0x3e   : > { %p1033_p10 = por %p1032_p7, %p1031_p4 }
  0x40   : > { %p1034_p12 = pnand %p1033_p10, %p1027_p13 }
  0x42   : > { %1037 = shalt.err (!%p1034_p12)
}
  0x43   : > { %s1038_s28 = scalar_lea.vmem %s231_s4, 32  ;;  %s1176_s18 = smov [#allocation7]  }
  0x44   : > { %p1039_p9 = scmp.ne.s32.totalorder %s231_s4, %s1038_s28  ;;  %s1043_s22 = sshll.u32 %s1176_s18, 4  ;;  %s1044_s22 = int_to_ptr.vmem [resolvable:$false] %s1043_s22 }
  0x45   : > { %s1045_s23 = scalar_lea.vmem %s1044_s22, 64  ;;  %p1046_p8 = scmp.lt.s32.totalorder %s231_s4, %s1044_s22 }
  0x46   : > { %p1041_p1 = pnand %p1039_p9, %p995_p3  ;;  %p1047_p11 = scmp.lt.s32.totalorder %s1045_s23, %s1038_s28 }
  0x48   : > { %p1042_p6 = pneg %p1041_p1  ;;  %p1048_p2 = por %p1047_p11, %p1046_p8 }
  0x4a   : > { %p1049_p5 = pnand %p1048_p2, %p1042_p6 }
  0x4c   : > { %1052 = shalt.err (!%p1049_p5)
}
  0x4d   : > { %892 = dma.hbm_to_vmem [thread:$0]  (!%p1280_p0), %s1325_s29, 32, %s231_s4, %s214_s6  }
  0x4e   : > { %p1788_p13 = scmp.ne.s32.totalorder %s1787_s21, 0 }
  0x4f   : > { %s1350_s30 = sand.u32 (!%p1788_p13), 1, %s1155_s13   ;;  %p1789_p8 = scmp.ne.s32.totalorder (!%p1788_p13), %s1782_s24, 0 }
  0x50   : > { %239 = sbr.rel (%p1788_p13) target bundleno = 442 (0x1ba), region = 28  ;;  %s861_s8 = sshll.u32 (!%p1788_p13), %s1350_s30, 7 }
  0x51   : > { %s242_s10 = scalar_lea.sflag (!%p1788_p13), [#allocation5], %s1350_s30  ;;  %s1354_s5 = scalar_lea.vmem (!%p1788_p13), [#allocation4], %s861_s8 }
  0x57   : > { %1134 = dma.done.wait (%p1789_p8), %s242_s10, 2048  }
  0x58   : > { %1136 = vsyncadd (%p1789_p8), %s242_s10, 4294965248  ;;  %s862_s9 = sshll.u32 %s1350_s30, 1  ;;  %s251_s21 = scalar_lea.sflag [#allocation8], %s1350_s30 }
  0x59   : > { %s1362_s29 = scalar_lea.vmem [#allocation7], %s862_s9 }
  0x5a   : > { %1138 = dma.done.wait (%p1789_p8), %s251_s21, 32  }
  0x5b   : > { %1140 = vsyncadd (%p1789_p8), %s251_s21, 4294967264  ;;  %v299_v0 = vlaneseq  ;;  %v1177_v2 = vmov 0.0   ;;  %v1379_v3 = vld [vmem:[%s1354_s5] sm:$0xff]  ;;  %v1382_v4 = vld [vmem:[%s1354_s5 + $0x8] sm:$0xff]  ;;  %v1178_v43 = vmov 0   ;;  %s865_s24 = sshll.u32 %s1163_s15, 4 }
  0x5c   : > { %v1385_v5 = vld [vmem:[%s1354_s5 + $0x10] sm:$0xff]  ;;  %v1388_v6 = vld [vmem:[%s1354_s5 + $0x18] sm:$0xff]  ;;  %v1391_v7 = vld [vmem:[%s1354_s5 + $0x20] sm:$0xff]  ;;  %v1179_v53 = vmov 1966171168   ;;  %s278_s4 = scalar_lea.vmem [#allocation9], %s1350_s30  ;;  %s1693_s18 = scalar_lea.hbm %s1777_s2, %s865_s24 }
  0x5d   : > { %vm1368_vm0 = vcmp.lt.s32.totalorder %v299_v0, 256  ;;  %v1394_v8 = vld [vmem:[%s1354_s5 + $0x28] sm:$0xff]  ;;  %v1397_v9 = vld [vmem:[%s1354_s5 + $0x30] sm:$0xff]  ;;  %v1400_v10 = vld [vmem:[%s1354_s5 + $0x38] sm:$0xff]  ;;  %v379_v12 = vmax.f32 %v1379_v3, %v1391_v7  ;;  %v1443_v37 = vshrl.u32 %v299_v0, 7  ;;  %v1452_v54 = vunpack.c.l.s4 %v1179_v53  ;;  %s700_s6 = sshll.u32 %s278_s4, 4  ;;  %s1695_s6 = int_to_ptr.vmem [resolvable:$true] %s700_s6 }
  0x5e   : > { %303 = vst.msk [vmem:[#allocation2] sm:$0x3] %vm1368_vm0, %v1177_v2  ;;  %304 = vst.msk [vmem:[#allocation3] sm:$0x3] %vm1368_vm0, %v1177_v2  ;;  %v1403_v11 = vld [vmem:[%s1354_s5 + $0x40] sm:$0xff]  ;;  %v392_v13 = vmax.f32 %v1382_v4, %v1394_v8  ;;  %v1410_v14 = vld [vmem:[%s1354_s5 + $0x48] sm:$0xff]  ;;  %v380_v17 = vmax.f32 %v1385_v5, %v1397_v9  ;;  %v393_v18 = vmax.f32 %v1388_v6, %v1400_v10 }
  0x5f   : > { %v1413_v15 = vld [vmem:[%s1354_s5 + $0x50] sm:$0xff]  ;;  %v1416_v16 = vld [vmem:[%s1354_s5 + $0x58] sm:$0xff]  ;;  %v1423_v19 = vld [vmem:[%s1354_s5 + $0x60] sm:$0xff]  ;;  %v381_v22 = vmax.f32 %v379_v12, %v1403_v11  ;;  %v1446_v42 = vsub.s32 0, %v1443_v37  ;;  %v1450_v52 = vsub.s32 1, %v1443_v37  ;;  %v1464_v61 = vadd.s32 8, %v1443_v37 }
  0x60   : > { %v1426_v20 = vld [vmem:[%s1354_s5 + $0x68] sm:$0xff]  ;;  %v1429_v21 = vld [vmem:[%s1354_s5 + $0x70] sm:$0xff]  ;;  %v394_v23 = vmax.f32 %v392_v13, %v1410_v14  ;;  %v1434_v24 = vld [vmem:[%s1354_s5 + $0x78] sm:$0xff]  ;;  %v382_v26 = vmax.f32 %v380_v17, %v1413_v15  ;;  %v395_v27 = vmax.f32 %v393_v18, %v1416_v16  ;;  %v580_v62 = vunpack.c.0.s8 %v1452_v54  ;;  %s284_s7 = scalar_lea.vmem [#allocation10], %s1350_s30  ;;  %s683_s23 = scalar_lea.sflag [#allocation6], %s1350_s30 }
  0x61   : > { %v321_v25 = vld [vmem:[%s1362_s29] sm:$0x3]  ;;  %v383_v29 = vmax.f32 %v381_v22, %v1423_v19  ;;  %s714_s11 = sshll.u32 %s284_s7, 4  ;;  %s1053_s8 = scalar_lea.vmem %s1695_s6, 16  ;;  %s1697_s11 = int_to_ptr.vmem [resolvable:$true] %s714_s11 }
  0x62   : > { %v332_v28 = vmax.f32 %v321_v25, 1e-30  ;;  %v396_v30 = vmax.f32 %v394_v23, %v1426_v20  ;;  %v384_v31 = vmax.f32 %v382_v26, %v1429_v21  ;;  %v397_v32 = vmax.f32 %v395_v27, %v1434_v24  ;;  %p1054_p0 = scmp.ne.s32.totalorder %s1695_s6, %s1053_s8  ;;  %p1804_p3 = scmp.ne.s32.totalorder %s1783_s25, 0 }
  0x63   : > { %vm337_vm1 = vcmp.gt.f32.partialorder %v321_v25, 0.0  ;;  %s1180_s10 = smov [#allocation9]  }
  0x64   : > { %955 = vlog2.f32 %v332_v28  ;;  %v385_v33 = vmax.f32 %v383_v29, %v384_v31  ;;  %v398_v34 = vmax.f32 %v396_v30, %v397_v32  ;;  %v338_v44 = vsel %vm337_vm1, 1, %v1178_v43  ;;  %p1055_p11 = pnand %p1054_p0, %p1804_p3  ;;  %s1057_s5 = sshll.u32 %s1180_s10, 4  ;;  %s1058_s5 = int_to_ptr.vmem [resolvable:$false] %s1057_s5 }
  0x65   : > { %v342_v51 = vrot.slane %v338_v44, %v1446_v42  ;;  %v346_v59 = vrot.slane %v338_v44, %v1450_v52  ;;  %v1486_v29 = vadd.s32 16, %v1443_v37  ;;  %v1489_v30 = vadd.s32 24, %v1443_v37  ;;  %s1059_s9 = scalar_lea.vmem %s1058_s5, 32  ;;  %p1060_p7 = scmp.lt.s32.totalorder %s1695_s6, %s1058_s5 }
  0x66   : > { %v386_v35 = vrot.slane %v385_v33, 4  ;;  %v399_v36 = vrot.slane %v398_v34, 4  ;;  %v1559_v32 = vadd.s32 40, %v1443_v37  ;;  %p1056_p4 = pneg %p1055_p11  ;;  %p1061_p10 = scmp.lt.s32.totalorder %s1059_s9, %s1053_s8 }
  0x67   : > { %vm1459_vm2 = vcmp.ne.s32.totalorder %v342_v51, 0  ;;  %vm1479_vm5 = vcmp.ne.s32.totalorder %v346_v59, 0 }
  0x68   : > { %v387_v38 = vmax.f32 %v385_v33, %v386_v35  ;;  %v400_v39 = vmax.f32 %v398_v34, %v399_v36  ;;  %p1062_p12 = por %p1061_p10, %p1060_p7 }
  0x6a   : > { %v388_v40 = vrot.slane %v387_v38, 2  ;;  %v401_v41 = vrot.slane %v400_v39, 2  ;;  %p1063_p9 = pnand %p1062_p12, %p1056_p4 }
  0x6c   : > { %v389_v45 = vmax.f32 %v387_v38, %v388_v40  ;;  %v402_v46 = vmax.f32 %v400_v39, %v401_v41 }
  0x6e   : > { %v956_v47 = vpop.eup %955  ;;  %v390_v49 = vrot.slane %v389_v45, 1  ;;  %v403_v50 = vrot.slane %v402_v46, 1 }
  0x6f   : > { %v334_v48 = vmul.f32 0.6931472, %v956_v47 }
  0x70   : > { %v1454_v56 = vmax.f32 %v389_v45, %v390_v49  ;;  %v1456_v57 = vmax.f32 %v402_v46, %v403_v50  ;;  %v1521_v46 = vadd.s32 32, %v1443_v37 }
  0x71   : > { %v335_v55 = vmul.f32 26.274036, %v334_v48 }
  0x72   : > { %v405_v63 = vsub.f32 %v1379_v3, %v1454_v56  ;;  %v406_v0 = vsub.f32 %v1382_v4, %v1456_v57  ;;  %v407_v17 = vsub.f32 %v1385_v5, %v1454_v56  ;;  %v408_v18 = vsub.f32 %v1388_v6, %v1456_v57 }
  0x73   : > { %v873_v58 = vcvt.f32.s32 %v335_v55  ;;  %v409_v28 = vsub.f32 %v1391_v7, %v1454_v56  ;;  %v410_v33 = vsub.f32 %v1394_v8, %v1456_v57  ;;  %v411_v34 = vsub.f32 %v1397_v9, %v1454_v56 }
  0x74   : > { %v421_v35 = vmul.f32 1.442695, %v405_v63  ;;  %v423_v36 = vmul.f32 1.442695, %v406_v0  ;;  %v425_v38 = vmul.f32 1.442695, %v407_v17  ;;  %v412_v39 = vsub.f32 %v1400_v10, %v1456_v57 }
  0x75   : > { %vm351_vm3 = vcmp.ge.s32.totalorder %v873_v58, 0  ;;  %vm365_vm4 = vcmp.lt.s32.totalorder %v873_v58, 64  ;;  %v427_v40 = vmul.f32 1.442695, %v408_v18  ;;  %v491_v41 = vrot.slane %v873_v58, %v1446_v42 }
  0x76   : > { %v352_v12 = vsel %vm351_vm3, 1, %v1178_v43  ;;  %v366_v13 = vsel %vm365_vm4, 1, %v1178_v43  ;;  %v413_v44 = vsub.f32 %v1403_v11, %v1454_v56  ;;  %957 = vpow2.f32 %v421_v35 }
  0x77   : > { %v356_v22 = vrot.slane %v352_v12, %v1446_v42  ;;  %v360_v23 = vrot.slane %v352_v12, %v1450_v52  ;;  %v370_v25 = vrot.slane %v366_v13, %v1446_v42  ;;  %v374_v26 = vrot.slane %v366_v13, %v1450_v52 }
  0x78   : > { %v429_v45 = vmul.f32 1.442695, %v409_v28  ;;  %v414_v47 = vsub.f32 %v1410_v14, %v1456_v57  ;;  %v415_v48 = vsub.f32 %v1413_v15, %v1454_v56  ;;  %959 = vpow2.f32 %v423_v36 }
  0x79   : > { %vm1491_vm6 = vcmp.ne.s32.totalorder %v356_v22, 0  ;;  %vm1495_vm7 = vcmp.ne.s32.totalorder %v360_v23, 0  ;;  %vm375_vm8 = vcmp.ne.s32.totalorder %v370_v25, 0  ;;  %vm376_vm11 = vcmp.ne.s32.totalorder %v374_v26, 0 }
  0x7a   : > { %vm363_vm9 = vmand %vm1459_vm2, %vm1491_vm6  ;;  %v431_v49 = vmul.f32 1.442695, %v410_v33  ;;  %v416_v51 = vsub.f32 %v1416_v16, %v1456_v57  ;;  %v417_v53 = vsub.f32 %v1423_v19, %v1454_v56  ;;  %961 = vpow2.f32 %v425_v38 }
  0x7b   : > { %vm364_vm10 = vmand %vm1479_vm5, %vm1495_vm7  ;;  %v433_v55 = vmul.f32 1.442695, %v411_v34  ;;  %963 = vpow2.f32 %v427_v40  ;;  %v435_v59 = vmul.f32 1.442695, %v412_v39  ;;  %v495_v60 = vrot.slane %v873_v58, %v1450_v52 }
  0x7c   : > { %vm1514_vm12 = vmand %vm363_vm9, %vm375_vm8  ;;  %v418_v0 = vsub.f32 %v1426_v20, %v1456_v57  ;;  %v419_v12 = vsub.f32 %v1429_v21, %v1454_v56  ;;  %965 = vpow2.f32 %v429_v45  ;;  %v437_v13 = vmul.f32 1.442695, %v413_v44 }
  0x7d   : > { %vm1527_vm13 = vmand %vm364_vm10, %vm376_vm11  ;;  %v496_v63 = vsel %vm1514_vm12, %v491_v41, 4294967295  ;;  %v420_v17 = vsub.f32 %v1434_v24, %v1456_v57  ;;  %967 = vpow2.f32 %v431_v49  ;;  %v439_v18 = vmul.f32 1.442695, %v414_v47 }
  0x7e   : > { %v497_v22 = vsel %vm1527_vm13, %v495_v60, 4294967295  ;;  %969 = vpow2.f32 %v433_v55  ;;  %v441_v58 = vmul.f32 1.442695, %v415_v48  ;;  %v443_v23 = vmul.f32 1.442695, %v416_v51 }
  0x7f   : > { %v1547_v25 = vrot.slane %v496_v63, %v1446_v42  ;;  %971 = vpow2.f32 %v435_v59  ;;  %v1550_v26 = vrot.slane %v497_v22, %v1446_v42  ;;  %v863_v27 = vsel %vm1514_vm12, 1.0, %v1177_v2 }
  0x80   : > { %v864_v28 = vsel %vm1527_vm13, 1.0, %v1177_v2  ;;  %973 = vpow2.f32 %v437_v13  ;;  %v445_v31 = vmul.f32 1.442695, %v417_v53  ;;  %v1562_v33 = vadd.s32 48, %v1443_v37  ;;  %v958_v38 = vpop.eup %957 }
  0x81   : > { %975 = vpow2.f32 %v439_v18  ;;  %v447_v34 = vmul.f32 1.442695, %v418_v0  ;;  %v1565_v35 = vadd.s32 56, %v1443_v37  ;;  %v1570_v36 = vsub.s32 %v580_v62, %v1443_v37 }
  0x82   : > { %977 = vpow2.f32 %v441_v58  ;;  %v449_v2 = vmul.f32 1.442695, %v419_v12  ;;  %v451_v39 = vmul.f32 1.442695, %v420_v17  ;;  %v606_v40 = vcombine.low %v863_v27, %v864_v28  ;;  %v960_v41 = vpop.eup %959 }
  0x83   : > { %979 = vpow2.f32 %v443_v23  ;;  %vm506_vm14 = vcmp.eq.s32.totalorder %v1443_v37, %v1547_v25  ;;  %vm507_vm15 = vcmp.eq.s32.totalorder %v1443_v37, %v1550_v26  ;;  %vm508_vm1 = vcmp.eq.s32.totalorder %v1464_v61, %v1547_v25 }
  0x84   : > { %v962_v44 = vpop.eup %961  ;;  %981 = vpow2.f32 %v445_v31  ;;  %vm509_vm2 = vcmp.eq.s32.totalorder %v1464_v61, %v1550_v26  ;;  %vm510_vm3 = vcmp.eq.s32.totalorder %v1486_v29, %v1547_v25  ;;  %vm512_vm4 = vcmp.eq.s32.totalorder %v1489_v30, %v1547_v25 }
  0x85   : > { %v964_v54 = vpop.eup %963  ;;  %983 = vpow2.f32 %v447_v34  ;;  %v453_v62 = vadd.f32 %v962_v44, %v958_v38  ;;  %vm511_vm5 = vcmp.eq.s32.totalorder %v1486_v29, %v1550_v26  ;;  %vm514_vm6 = vcmp.eq.s32.totalorder %v1521_v46, %v1547_v25  ;;  %v599_v29 = vld [vmem:[#allocation3] sm:$0x3] }
  0x86   : > { %v966_v45 = vpop.eup %965  ;;  %985 = vpow2.f32 %v449_v2  ;;  %v466_v47 = vadd.f32 %v964_v54, %v960_v41  ;;  %v522_v48 = vsel %vm506_vm14, %v1379_v3, 0.0  ;;  %v523_v49 = vsel %vm507_vm15, %v1382_v4, 0.0 }
  0x87   : > { %v968_v51 = vpop.eup %967  ;;  %987 = vpow2.f32 %v451_v39  ;;  %v454_v53 = vadd.f32 %v966_v45, %v453_v62  ;;  %v524_v55 = vsel %vm508_vm1, %v1385_v5, 0.0  ;;  %v525_v59 = vsel %vm509_vm2, %v1388_v6, 0.0 }
  0x88   : > { %v970_v60 = vpop.eup %969  ;;  %v467_v3 = vadd.f32 %v968_v51, %v466_v47  ;;  %vm513_vm7 = vcmp.eq.s32.totalorder %v1489_v30, %v1550_v26  ;;  %vm515_vm8 = vcmp.eq.s32.totalorder %v1521_v46, %v1550_v26  ;;  %vm516_vm9 = vcmp.eq.s32.totalorder %v1559_v32, %v1547_v25 }
  0x89   : > { %v972_v4 = vpop.eup %971  ;;  %v455_v37 = vadd.f32 %v970_v60, %v454_v53  ;;  %vm517_vm10 = vcmp.eq.s32.totalorder %v1559_v32, %v1550_v26  ;;  %v526_v5 = vsel %vm510_vm3, %v1391_v7, 0.0  ;;  %v527_v6 = vsel %vm511_vm5, %v1394_v8, 0.0 }
  0x8a   : > { %v974_v61 = vpop.eup %973  ;;  %v468_v63 = vadd.f32 %v972_v4, %v467_v3  ;;  %v538_v0 = vadd.f32 %v524_v55, %v522_v48  ;;  %v551_v12 = vadd.f32 %v525_v59, %v523_v49  ;;  %v613_v13 = vrot.slane %v606_v40, %v1570_v36 }
  0x8b   : > { %v976_v17 = vpop.eup %975  ;;  %v456_v18 = vadd.f32 %v974_v61, %v455_v37  ;;  %vm518_vm11 = vcmp.eq.s32.totalorder %v1562_v33, %v1547_v25  ;;  %v528_v7 = vsel %vm512_vm4, %v1397_v9, 0.0  ;;  %v529_v8 = vsel %vm513_vm7, %v1400_v10, 0.0 }
  0x8c   : > { %v978_v22 = vpop.eup %977  ;;  %v469_v58 = vadd.f32 %v976_v17, %v468_v63  ;;  %v539_v23 = vadd.f32 %v538_v0, %v526_v5  ;;  %v552_v27 = vadd.f32 %v551_v12, %v527_v6  ;;  %v620_v28 = vrot.slane %v613_v13, %v1570_v36 }
  0x8d   : > { %v980_v31 = vpop.eup %979  ;;  %v457_v34 = vadd.f32 %v978_v22, %v456_v18  ;;  %vm519_vm14 = vcmp.eq.s32.totalorder %v1562_v33, %v1550_v26  ;;  %v530_v9 = vsel %vm514_vm6, %v1403_v11, 0.0  ;;  %v531_v10 = vsel %vm515_vm8, %v1410_v14, 0.0 }
  0x8e   : > { %v982_v30 = vpop.eup %981  ;;  %v470_v38 = vadd.f32 %v980_v31, %v469_v58  ;;  %v540_v2 = vadd.f32 %v539_v23, %v528_v7  ;;  %v553_v39 = vadd.f32 %v552_v27, %v529_v8  ;;  %v622_v40 = vadd.f32 %v620_v28, %v599_v29 }
  0x8f   : > { %v984_v41 = vpop.eup %983  ;;  %v458_v44 = vadd.f32 %v982_v30, %v457_v34  ;;  %vm520_vm15 = vcmp.eq.s32.totalorder %v1565_v35, %v1547_v25  ;;  %v532_v11 = vsel %vm516_vm9, %v1413_v15, 0.0  ;;  %v533_v14 = vsel %vm517_vm10, %v1416_v16, 0.0 }
  0x90   : > { %v986_v46 = vpop.eup %985  ;;  %v471_v54 = vadd.f32 %v984_v41, %v470_v38  ;;  %vm521_vm1 = vcmp.eq.s32.totalorder %v1565_v35, %v1550_v26  ;;  %v541_v62 = vadd.f32 %v540_v2, %v530_v9  ;;  %v554_v45 = vadd.f32 %v553_v39, %v531_v10  ;;  %623 = vst.msk [vmem:[#allocation3] sm:$0x3] %vm1368_vm0, %v622_v40 }
  0x91   : > { %v988_v47 = vpop.eup %987  ;;  %v459_v48 = vadd.f32 %v986_v46, %v458_v44  ;;  %v534_v15 = vsel %vm518_vm11, %v1423_v19, 0.0  ;;  %v535_v16 = vsel %vm519_vm14, %v1426_v20, 0.0  ;;  %v536_v55 = vsel %vm520_vm15, %v1429_v21, 0.0  ;;  %v572_v44 = vld [vmem:[#allocation2] sm:$0x3] }
  0x92   : > { %v472_v32 = vadd.f32 %v988_v47, %v471_v54  ;;  %v542_v49 = vadd.f32 %v541_v62, %v532_v11  ;;  %v555_v51 = vadd.f32 %v554_v45, %v533_v14  ;;  %v537_v59 = vsel %vm521_vm1, %v1434_v24, 0.0 }
  0x93   : > { %v460_v53 = vrot.slane %v459_v48, 4 }
  0x94   : > { %v473_v60 = vrot.slane %v472_v32, 4  ;;  %v543_v3 = vadd.f32 %v542_v49, %v534_v15  ;;  %v556_v4 = vadd.f32 %v555_v51, %v535_v16 }
  0x95   : > { %v461_v19 = vadd.f32 %v460_v53, %v459_v48 }
  0x96   : > { %v474_v37 = vadd.f32 %v473_v60, %v472_v32  ;;  %v544_v5 = vadd.f32 %v543_v3, %v536_v55  ;;  %v557_v6 = vadd.f32 %v556_v4, %v537_v59 }
  0x97   : > { %v462_v26 = vrot.slane %v461_v19, 2 }
  0x98   : > { %v475_v20 = vrot.slane %v474_v37, 2  ;;  %v545_v33 = vrot.slane %v544_v5, 4  ;;  %v558_v61 = vrot.slane %v557_v6, 4 }
  0x99   : > { %v463_v63 = vadd.f32 %v462_v26, %v461_v19 }
  0x9a   : > { %v476_v0 = vadd.f32 %v475_v20, %v474_v37  ;;  %v546_v12 = vadd.f32 %v545_v33, %v544_v5  ;;  %v559_v17 = vadd.f32 %v558_v61, %v557_v6 }
  0x9b   : > { %v464_v13 = vrot.slane %v463_v63, 1 }
  0x9c   : > { %v477_v25 = vrot.slane %v476_v0, 1  ;;  %v547_v24 = vrot.slane %v546_v12, 2  ;;  %v560_v18 = vrot.slane %v559_v17, 2 }
  0x9d   : > { %v465_v21 = vadd.f32 %v464_v13, %v463_v63 }
  0x9e   : > { %v478_v35 = vadd.f32 %v477_v25, %v476_v0  ;;  %v548_v7 = vadd.f32 %v547_v24, %v546_v12  ;;  %v561_v8 = vadd.f32 %v560_v18, %v559_v17 }
  0x9f   : > { %989 = vlog2.f32 %v465_v21 }
  0xa0   : > { %991 = vlog2.f32 %v478_v35  ;;  %v549_v29 = vrot.slane %v548_v7, 1  ;;  %v562_v22 = vrot.slane %v561_v8, 1 }
  0xa2   : > { %v550_v27 = vadd.f32 %v549_v29, %v548_v7  ;;  %v563_v31 = vadd.f32 %v562_v22, %v561_v8 }
  0xa9   : > { %v990_v58 = vpop.eup %989 }
  0xaa   : > { %v992_v23 = vpop.eup %991  ;;  %v565_v28 = vmul.f32 0.6931472, %v990_v58 }
  0xab   : > { %v567_v34 = vmul.f32 0.6931472, %v992_v23 }
  0xac   : > { %v568_v9 = vadd.f32 %v565_v28, %v1454_v56  ;;  %v655_v56 = vld [vmem:[#allocation3] sm:$0x3] }
  0xad   : > { %v569_v10 = vadd.f32 %v567_v34, %v1456_v57  ;;  %v660_v57 = vrot.slane %v655_v56, %v1446_v42  ;;  %v664_v46 = vrot.slane %v655_v56, %v1450_v52 }
  0xae   : > { %v570_v30 = vsub.f32 %v568_v9, %v550_v27 }
  0xaf   : > { %v571_v38 = vsub.f32 %v569_v10, %v563_v31 }
  0xb0   : > { %v573_v2 = vsel %vm1514_vm12, %v570_v30, 0.0  ;;  %vm639_vm12 = vcmask 1040384  }
  0xb1   : > { %v574_v39 = vsel %vm1527_vm13, %v571_v38, 0.0  ;;  %v667_v47 = vsel %vm639_vm12, %v660_v57, 0.0  ;;  %v668_v48 = vsel %vm639_vm12, %v664_v46, 0.0 }
  0xb2   : > { %v577_v40 = vcombine.low %v573_v2, %v574_v39  ;;  %v669_v15 = vadd.f32 %v668_v48, %v667_v47 }
  0xb4   : > { %v584_v41 = vrot.slane %v577_v40, %v1570_v36 }
  0xb6   : > { %v591_v11 = vrot.slane %v584_v41, %v1570_v36 }
  0xb8   : > { %v593_v14 = vadd.f32 %v591_v11, %v572_v44 }
  0xba   : > { %598 = vst.msk [vmem:[#allocation2] sm:$0x3] %vm1368_vm0, %v593_v14 }
  0xc1   : > { %v627_v43 = vld [vmem:[#allocation2] sm:$0x3] }
  0xc2   : > { %v632_v50 = vrot.slane %v627_v43, %v1446_v42  ;;  %v636_v54 = vrot.slane %v627_v43, %v1450_v52 }
  0xc4   : > { %v640_v62 = vsel %vm639_vm12, %v632_v50, 0.0  ;;  %v641_v45 = vsel %vm639_vm12, %v636_v54, 0.0 }
  0xc5   : > { %v642_v36 = vadd.f32 %v641_v45, %v640_v62 }
  0xc7   : > { %643 = vadd.xlane.f32.xlu0 %v642_v36 }
  0xcb   : > { %670 = vadd.xlane.f32.xlu0 %v669_v15 }
 0x154   : > { %v644_v1 = vpop.xlane.xlu0 %643 }
 0x155   : > { %v645_v16 = vrot.slane %v644_v1, 4 }
 0x157   : > { %v646_v32 = vadd.f32 %v645_v16, %v644_v1 }
 0x158   : > { %v671_v49 = vpop.xlane.xlu0 %670 }
 0x159   : > { %v647_v51 = vrot.slane %v646_v32, 2  ;;  %v672_v42 = vrot.slane %v671_v49, 4 }
 0x15b   : > { %v673_v52 = vadd.f32 %v672_v42, %v671_v49  ;;  %v648_v53 = vadd.f32 %v647_v51, %v646_v32 }
 0x15d   : > { %v674_v55 = vrot.slane %v673_v52, 2  ;;  %v649_v59 = vrot.slane %v648_v53, 1 }
 0x15f   : > { %v675_v60 = vadd.f32 %v674_v55, %v673_v52  ;;  %v650_v3 = vadd.f32 %v649_v59, %v648_v53 }
 0x161   : > { %874 = vpush %v650_v3  ;;  %v676_v4 = vrot.slane %v675_v60, 1 }
 0x163   : > { %v677_v19 = vadd.f32 %v676_v4, %v675_v60 }
 0x165   : > { %876 = vpush %v677_v19 }
 0x192   : > { %s875_s22 = spop %874 }
 0x193   : > { %v652_v37 = vstv %s875_s22 }
 0x194   : > { %654 = vst [vmem:[%s278_s4] sm:$0x1] %v652_v37 }
 0x195   : > { %1066 = shalt.err (!%p1063_p9)
}
 0x196   : > { %s1067_s21 = scalar_lea.hbm %s1693_s18, 16  ;;  %s1071_s19 = scalar_lea.hbm %s1777_s2, 32 }
 0x197   : > { %p1068_p1 = scmp.ne.s32.totalorder %s1693_s18, %s1067_s21  ;;  %p1072_p5 = scmp.lt.u32.totalorder %s1693_s18, %s1777_s2 }
 0x198   : > { %p1073_p13 = scmp.lt.u32.totalorder %s1071_s19, %s1067_s21  ;;  %p1075_p0 = scmp.lt.u32.totalorder %s1067_s21, %s1693_s18 }
 0x199   : > { %p1069_p6 = pnand %p1068_p1, %p1804_p3 }
 0x19a   : > { %p1074_p8 = por %p1073_p13, %p1072_p5 }
 0x19b   : > { %p1070_p2 = pneg %p1069_p6 }
 0x19c   : > { %p1076_p11 = por %p1075_p0, %p1074_p8 }
 0x19e   : > { %p1077_p4 = pnand %p1076_p11, %p1070_p2 }
 0x1a0   : > { %1080 = shalt.err (!%p1077_p4)
}
 0x1a1   : > { %882 = dma.vmem_to_hbm [thread:$0]  (%p1804_p3), %s1695_s6, 16, %s1693_s18, %s683_s23  }
 0x1a2   : > { %s877_s8 = spop %876  ;;  %s1726_s9 = scalar_lea.hbm %s1778_s3, %s865_s24 }
 0x1a3   : > { %v679_v5 = vstv %s877_s8  ;;  %s687_s21 = scalar_lea.sflag [#allocation11], %s1350_s30  ;;  %s1081_s29 = scalar_lea.vmem %s1697_s11, 16 }
 0x1a4   : > { %681 = vst [vmem:[%s284_s7] sm:$0x1] %v679_v5  ;;  %p1082_p7 = scmp.ne.s32.totalorder %s1697_s11, %s1081_s29  ;;  %s1181_s4 = smov [#allocation10]  }
 0x1a5   : > { %s1085_s19 = sshll.u32 %s1181_s4, 4  ;;  %s1086_s19 = int_to_ptr.vmem [resolvable:$false] %s1085_s19 }
 0x1a6   : > { %p1083_p10 = pnand %p1082_p7, %p1804_p3  ;;  %s1087_s6 = scalar_lea.vmem %s1086_s19, 32 }
 0x1a7   : > { %p1088_p9 = scmp.lt.s32.totalorder %s1697_s11, %s1086_s19  ;;  %p1089_p1 = scmp.lt.s32.totalorder %s1087_s6, %s1081_s29 }
 0x1a8   : > { %p1084_p12 = pneg %p1083_p10 }
 0x1a9   : > { %p1090_p6 = por %p1089_p1, %p1088_p9 }
 0x1ab   : > { %p1091_p2 = pnand %p1090_p6, %p1084_p12 }
 0x1ad   : > { %1094 = shalt.err (!%p1091_p2)
}
 0x1ae   : > { %s1095_s15 = scalar_lea.hbm %s1726_s9, 16  ;;  %s1099_s7 = scalar_lea.hbm %s1778_s3, 32 }
 0x1af   : > { %p1096_p5 = scmp.ne.s32.totalorder %s1726_s9, %s1095_s15  ;;  %p1100_p0 = scmp.lt.u32.totalorder %s1726_s9, %s1778_s3 }
 0x1b0   : > { %p1101_p11 = scmp.lt.u32.totalorder %s1099_s7, %s1095_s15  ;;  %p1103_p7 = scmp.lt.u32.totalorder %s1095_s15, %s1726_s9 }
 0x1b1   : > { %p1097_p13 = pnand %p1096_p5, %p1804_p3 }
 0x1b2   : > { %p1102_p4 = por %p1101_p11, %p1100_p0 }
 0x1b3   : > { %p1098_p8 = pneg %p1097_p13 }
 0x1b4   : > { %p1104_p10 = por %p1103_p7, %p1102_p4 }
 0x1b6   : > { %p1105_p12 = pnand %p1104_p10, %p1098_p8 }
 0x1b8   : > { %1108 = shalt.err (!%p1105_p12)
}
 0x1b9   : > { %883 = dma.vmem_to_hbm [thread:$0]  (%p1804_p3), %s1697_s11, 16, %s1726_s9, %s687_s21  }
 0x1ba PF: > { %s726_s28 = sand.u32 1, %s1151_s12   ;;  %p1805_p9 = scmp.ne.s32.totalorder %s1784_s27, 0 }
 0x1bb   : > { %p1806_p1 = scmp.ge.s32.totalorder %s1171_s17, 2  ;;  %s727_s22 = scalar_lea.sflag [#allocation6], %s726_s28 }
 0x1bd   : > { %p894_p6 = pnand %p1806_p1, %p1805_p9 }
 0x1bf   : > { %1142 = dma.done.wait (!%p894_p6), %s727_s22, 16  }
 0x1c0   : > { %1144 = vsyncadd (!%p894_p6), %s727_s22, 4294967280  ;;  %s735_s8 = scalar_lea.sflag [#allocation11], %s726_s28 }
 0x1c1   : > { %1146 = dma.done.wait (!%p894_p6), %s735_s8, 16  }
 0x1c2   : > { %1148 = vsyncadd (!%p894_p6), %s735_s8, 4294967280  ;;  %s26_s17 = sadd.s32 1, %s1171_s17   ;;  %s1807_s12 = smov %s1155_s13 }
 0x1c3   : > { %p23_p2 = scmp.ge.s32.totalorder %s26_s17, 4   ;;  %s1808_s13 = smov %s1159_s14 }
 0x1c4   : > { %s1809_s14 = smov %s1258_s26  ;;  %s1810_s15 = smov %s1167_s16 }
 0x1c5   : > { %s1811_s16 = smov %s1813_s20  ;;  %25 = sbr.rel (!%p23_p2) target bundleno = 10 (0xa), region = 111 }
 0x1cc   :  { %739 = vsyncpa [#allocation5], 1 }
 0x1cd   :  { %741 = vsyncpa [#allocation5 + $0x1], 1 }
 0x1ce   :  { %742 = vsyncpa [#allocation8], 1 }
 0x1cf   :  { %744 = vsyncpa [#allocation8 + $0x1], 1 }
 0x1d0   :  { %745 = vsyncpa [#allocation6], 1 }
 0x1d1   :  { %747 = vsyncpa [#allocation6 + $0x1], 1 }
 0x1d2   :  { %748 = vsyncpa [#allocation11], 1 }
 0x1d3   :  { %750 = vsyncpa [#allocation11 + $0x1], 1 }

</bundles_post_ra>
